<compile_context>
chip_gen: v5e
topology: v5e:2x2
jax: 0.10.0
libtpu: 0.0.40
codegen_flags: <defaults>
</compile_context>

<pallas_src>
import functools

import jax
import jax.numpy as jnp
from jax.experimental import pallas as pl
from jax.experimental.pallas import tpu as pltpu


def _nll_surv_kernel(hazards_ref, surv_ref, side_ref, out_ref,
                     *, alpha: float, eps: float, total_b: int,
                     need_tail_mask: bool):
    i = pl.program_id(0)

    # Cast to f32 after load (inputs may be bf16; HBM traffic stays at native width).
    hz = hazards_ref[...].astype(jnp.float32)      # (TB, T)
    sv = surv_ref[...].astype(jnp.float32)         # (TB, T)
    side = side_ref[...].astype(jnp.float32)       # (TB, 2): [:,0]=idx, [:,1]=event
    idx = side[:, 0:1].astype(jnp.int32)           # (TB, 1)
    ev = side[:, 1:2]                              # (TB, 1)

    tb, t_bins = hz.shape
    t_iota = jax.lax.broadcasted_iota(jnp.int32, (tb, t_bins), 1)

    # One-hot masks along T (reused).
    onehot = t_iota == idx              # selects hazards[b, idx] and surv[b, idx]
    prev_hit = t_iota == (idx - 1)      # selects surv[b, idx-1]; all-False when idx==0

    # Log-first: full-tile logs (same vreg count as a column log since T < 128),
    # then masked row-sums.  Empty prev_hit mask at idx==0 gives 0 == log(1.0),
    # exactly surv_padded[b, 0]; clamp semantics match torch.clamp(min=eps).
    log_hz = jnp.log(jnp.maximum(hz, eps))
    log_sv = jnp.log(jnp.maximum(sv, eps))

    # log hazards[b, idx] + log surv_padded[b, idx]   (fused single reduction)
    unc_term = jnp.sum(jnp.where(onehot, log_hz, 0.0)
                       + jnp.where(prev_hit, log_sv, 0.0),
                       axis=1, keepdims=True)                       # (TB, 1)
    # log surv_padded[b, idx + 1] == log surv[b, idx]
    cen_term = jnp.sum(jnp.where(onehot, log_sv, 0.0),
                       axis=1, keepdims=True)                       # (TB, 1)

    # per-row loss = uncensored + (1-alpha)*censored, with the batch-mean 1/B folded in.
    c_u = jnp.float32(1.0 / total_b)
    c_c = jnp.float32((1.0 - alpha) / total_b)
    contrib = -(c_u * ev * unc_term + c_c * (1.0 - ev) * cen_term)  # (TB, 1)

    if need_tail_mask:
        last = pl.num_programs(0) - 1

        @pl.when(i != last)
        def _steady():
            out_ref[0, 0] = jnp.sum(contrib)

        @pl.when(i == last)
        def _tail():
            # Mask rows beyond the true batch size (last, partially-filled tile).
            row = i * tb + jax.lax.broadcasted_iota(jnp.int32, (tb, 1), 0)
            out_ref[0, 0] = jnp.sum(jnp.where(row < total_b, contrib, 0.0))
    else:
        out_ref[0, 0] = jnp.sum(contrib)


def nll_surv_loss(hazards, surv, idx_duration, event, alpha=0.4, eps=1e-7,
                  block_b=8192, vmem_limit_bytes=48 * 1024 * 1024):
    """Pallas-backed equivalent of NllSurvLoss.nll_loss."""
    B, T = hazards.shape
    if surv is None:
        # Glue: matches the PyTorch fallback torch.cumprod(1 - hazards, dim=1).
        surv = jnp.cumprod(1.0 - hazards.astype(jnp.float32), axis=1).astype(hazards.dtype)

    # Pack the two per-row scalars into one (B, 2) f32 side input (single small DMA).
    # idx values are small integers (< T), exactly representable in f32.
    side = jnp.concatenate(
        [idx_duration.reshape(B, 1).astype(jnp.float32),
         event.reshape(B, 1).astype(jnp.float32)], axis=1)

    # Batch tile size: whole batch if small, otherwise a sublane-aligned tile.
    if B <= block_b:
        tb = B
    else:
        tb = max(8, (block_b // 8) * 8)
    num_tiles = pl.cdiv(B, tb)
    need_tail_mask = (B % tb) != 0

    kernel = functools.partial(
        _nll_surv_kernel, alpha=float(alpha), eps=float(eps),
        total_b=int(B), need_tail_mask=bool(need_tail_mask))

    partials = pl.pallas_call(
        kernel,
        out_shape=jax.ShapeDtypeStruct((num_tiles, 1), jnp.float32),
        grid=(num_tiles,),
        in_specs=[
            pl.BlockSpec((tb, T), lambda i: (i, 0)),   # hazards tile
            pl.BlockSpec((tb, T), lambda i: (i, 0)),   # surv tile
            pl.BlockSpec((tb, 2), lambda i: (i, 0)),   # packed [idx, event] tile
        ],
        # One scalar partial sum per tile (independent blocks -> "parallel" axis,
        # lets v7x megacore shard the grid across both TensorCores).
        out_specs=pl.BlockSpec((1, 1), lambda i: (i, 0),
                               memory_space=pltpu.MemorySpace.SMEM),
        compiler_params=pltpu.CompilerParams(
            dimension_semantics=("parallel",),
            vmem_limit_bytes=int(vmem_limit_bytes),
        ),
    )(hazards, surv, side)
    # Tiny final reduction over per-tile partials (1/B already folded into contrib).
    return jnp.sum(partials)


def _reference_nll_surv_loss(hazards, surv, idx_duration, event, alpha=0.4, eps=1e-7):
    """Pure-JAX transcription of the PyTorch code, for validation."""
    B = idx_duration.shape[0]
    idx = idx_duration.reshape(B, 1).astype(jnp.int32)
    ev = event.reshape(B, 1).astype(jnp.float32)
    if surv is None:
        surv = jnp.cumprod(1.0 - hazards, axis=1)
    surv_padded = jnp.concatenate([jnp.ones_like(ev), surv], axis=1)
    g = lambda a, i: jnp.take_along_axis(a, i, axis=1)
    uncensored = -ev * (jnp.log(jnp.maximum(g(surv_padded, idx), eps))
                        + jnp.log(jnp.maximum(g(hazards, idx), eps)))
    censored = -(1.0 - ev) * jnp.log(jnp.maximum(g(surv_padded, idx + 1), eps))
    neg_l = censored + uncensored
    loss = (1.0 - alpha) * neg_l + alpha * uncensored
    return jnp.mean(loss)


if __name__ == "__main__":
    keys = jax.random.split(jax.random.PRNGKey(0), 9)

    # ---- Test 1: single-tile path (B=8, T=16), explicit surv ----
    B, T = 8, 16
    logits = jax.random.normal(keys[0], (B, T), dtype=jnp.float32)
    hazards = jax.nn.sigmoid(logits)                       # hazards in (0, 1)
    surv = jnp.cumprod(1.0 - hazards, axis=1)              # survival probabilities
    idx_duration = jax.random.randint(keys[1], (B,), 0, T, dtype=jnp.int32)
    event = jax.random.bernoulli(keys[2], 0.5, (B,)).astype(jnp.float32)

    loss = jax.block_until_ready(nll_surv_loss(hazards, surv, idx_duration, event))
    ref = _reference_nll_surv_loss(hazards, surv, idx_duration, event)
    assert jnp.allclose(loss, ref, rtol=1e-5, atol=1e-5), (loss, ref)

    # ---- Test 2: multi-tile path with a padded last tile (B=12, TB=8), surv=None ----
    B2 = 12
    logits2 = jax.random.normal(keys[3], (B2, T), dtype=jnp.float32)
    hazards2 = jax.nn.sigmoid(logits2)
    idx2 = jax.random.randint(keys[4], (B2,), 0, T, dtype=jnp.int32)
    event2 = jax.random.bernoulli(keys[5], 0.5, (B2,)).astype(jnp.float32)

    loss2 = jax.block_until_ready(
        nll_surv_loss(hazards2, None, idx2, event2, block_b=8))
    ref2 = _reference_nll_surv_loss(hazards2, None, idx2, event2)
    assert jnp.allclose(loss2, ref2, rtol=1e-5, atol=1e-5), (loss2, ref2)

    # ---- Test 3: multi-tile, exact division (B=16, TB=8) -> no tail-mask codegen ----
    B3 = 16
    logits3 = jax.random.normal(keys[6], (B3, T), dtype=jnp.float32)
    hazards3 = jax.nn.sigmoid(logits3)
    surv3 = jnp.cumprod(1.0 - hazards3, axis=1)
    idx3 = jax.random.randint(keys[7], (B3,), 0, T, dtype=jnp.int32)
    event3 = jax.random.bernoulli(keys[8], 0.5, (B3,)).astype(jnp.float32)

    loss3 = jax.block_until_ready(
        nll_surv_loss(hazards3, surv3, idx3, event3, block_b=8))
    ref3 = _reference_nll_surv_loss(hazards3, surv3, idx3, event3)
    assert jnp.allclose(loss3, ref3, rtol=1e-5, atol=1e-5), (loss3, ref3)

    print("KERNEL_OK")
</pallas_src>

<mosaic_0001>
module attributes {stable_mosaic.version = 11 : i64} {
  func.func @_nll_surv_kernel(%arg0: i32, %arg1: memref<8x16xf32, #tpu.memory_space<vmem>>, %arg2: memref<8x16xf32, #tpu.memory_space<vmem>>, %arg3: memref<8x2xf32, #tpu.memory_space<vmem>>, %arg4: memref<1x1xf32, #tpu.memory_space<smem>>) attributes {dimension_semantics = [#tpu.dimension_semantics<parallel>], iteration_bounds = array<i64: 1>, scalar_prefetch = 0 : i64, scratch_operands = 0 : i64, tpu.core_type = #tpu.core_type<tc>, window_params = [{transform_indices = @transform_0, window_bounds = array<i64: 8, 16>}, {transform_indices = @transform_1, window_bounds = array<i64: 8, 16>}, {transform_indices = @transform_2, window_bounds = array<i64: 8, 2>}, {transform_indices = @transform_3, window_bounds = array<i64: 1, 1>}]} {
    %c0 = arith.constant 0 : index
    %c0_0 = arith.constant 0 : index
    %0 = vector.load %arg1[%c0, %c0_0] : memref<8x16xf32, #tpu.memory_space<vmem>>, vector<8x16xf32>
    %c0_1 = arith.constant 0 : index
    %c0_2 = arith.constant 0 : index
    %1 = vector.load %arg2[%c0_1, %c0_2] : memref<8x16xf32, #tpu.memory_space<vmem>>, vector<8x16xf32>
    %c0_3 = arith.constant 0 : index
    %c0_4 = arith.constant 0 : index
    %2 = vector.load %arg3[%c0_3, %c0_4] : memref<8x2xf32, #tpu.memory_space<vmem>>, vector<8x2xf32>
    %3 = vector.extract_strided_slice %2 {offsets = [0, 0], sizes = [8, 1], strides = [1, 1]} : vector<8x2xf32> to vector<8x1xf32>
    %4 = arith.fptosi %3 : vector<8x1xf32> to vector<8x1xi32>
    %5 = vector.extract_strided_slice %2 {offsets = [0, 1], sizes = [8, 1], strides = [1, 1]} : vector<8x2xf32> to vector<8x1xf32>
    %6 = tpu.iota {dimensions = array<i32: 1>} : vector<8x16xi32>
    %7 = vector.broadcast %4 : vector<8x1xi32> to vector<8x16xi32>
    %8 = arith.cmpi eq, %6, %7 : vector<8x16xi32>
    %c1_i32 = arith.constant 1 : i32
    %9 = vector.broadcast %c1_i32 : i32 to vector<8x1xi32>
    %10 = arith.subi %4, %9 : vector<8x1xi32>
    %11 = vector.broadcast %10 : vector<8x1xi32> to vector<8x16xi32>
    %12 = arith.cmpi eq, %6, %11 : vector<8x16xi32>
    %cst = arith.constant 1.000000e-07 : f32
    %13 = vector.broadcast %cst : f32 to vector<8x16xf32>
    %14 = arith.maximumf %0, %13 : vector<8x16xf32>
    %15 = math.log %14 : vector<8x16xf32>
    %cst_5 = arith.constant 1.000000e-07 : f32
    %16 = vector.broadcast %cst_5 : f32 to vector<8x16xf32>
    %17 = arith.maximumf %1, %16 : vector<8x16xf32>
    %18 = math.log %17 : vector<8x16xf32>
    %cst_6 = arith.constant 0.000000e+00 : f32
    %19 = vector.broadcast %cst_6 : f32 to vector<8x16xf32>
    %20 = arith.select %8, %15, %19 : vector<8x16xi1>, vector<8x16xf32>
    %cst_7 = arith.constant 0.000000e+00 : f32
    %21 = vector.broadcast %cst_7 : f32 to vector<8x16xf32>
    %22 = arith.select %12, %18, %21 : vector<8x16xi1>, vector<8x16xf32>
    %23 = arith.addf %20, %22 : vector<8x16xf32>
    %cst_8 = arith.constant dense<0.000000e+00> : vector<8xf32>
    %24 = vector.multi_reduction <add>, %23, %cst_8 [1] : vector<8x16xf32> to vector<8xf32>
    %25 = vector.shape_cast %24 : vector<8xf32> to vector<8x1xf32>
    %cst_9 = arith.constant 0.000000e+00 : f32
    %26 = vector.broadcast %cst_9 : f32 to vector<8x16xf32>
    %27 = arith.select %8, %18, %26 : vector<8x16xi1>, vector<8x16xf32>
    %cst_10 = arith.constant dense<0.000000e+00> : vector<8xf32>
    %28 = vector.multi_reduction <add>, %27, %cst_10 [1] : vector<8x16xf32> to vector<8xf32>
    %29 = vector.shape_cast %28 : vector<8xf32> to vector<8x1xf32>
    %cst_11 = arith.constant 1.250000e-01 : f32
    %30 = vector.broadcast %cst_11 : f32 to vector<8x1xf32>
    %31 = arith.mulf %30, %5 : vector<8x1xf32>
    %32 = arith.mulf %31, %25 : vector<8x1xf32>
    %cst_12 = arith.constant 1.000000e+00 : f32
    %33 = vector.broadcast %cst_12 : f32 to vector<8x1xf32>
    %34 = arith.subf %33, %5 : vector<8x1xf32>
    %cst_13 = arith.constant 7.500000e-02 : f32
    %35 = vector.broadcast %cst_13 : f32 to vector<8x1xf32>
    %36 = arith.mulf %35, %34 : vector<8x1xf32>
    %37 = arith.mulf %36, %29 : vector<8x1xf32>
    %38 = arith.addf %32, %37 : vector<8x1xf32>
    %cst_14 = arith.constant 0.000000e+00 : f32
    %39 = vector.broadcast %cst_14 : f32 to vector<8x1xf32>
    %40 = arith.subf %39, %38 : vector<8x1xf32>
    %41 = vector.shape_cast %40 : vector<8x1xf32> to vector<1x8x1xf32>
    %cst_15 = arith.constant dense<0.000000e+00> : vector<1xf32>
    %42 = vector.multi_reduction <add>, %41, %cst_15 [1, 2] : vector<1x8x1xf32> to vector<1xf32>
    %43 = vector.shape_cast %42 : vector<1xf32> to vector<1x1x1xf32>
    %44 = vector.extract %43[0, 0, 0] : f32 from vector<1x1x1xf32>
    %c0_16 = arith.constant 0 : index
    %c0_17 = arith.constant 0 : index
    %45 = memref.load %arg4[%c0_16, %c0_17] : memref<1x1xf32, #tpu.memory_space<smem>>
    memref.store %44, %arg4[%c0_16, %c0_17] : memref<1x1xf32, #tpu.memory_space<smem>>
    return
  }
  func.func @transform_0(%arg0: i32) -> (i32, i32) {
    %c0_i32 = arith.constant 0 : i32
    %c0_i32_0 = arith.constant 0 : i32
    return %arg0, %c0_i32 : i32, i32
  }
  func.func @transform_1(%arg0: i32) -> (i32, i32) {
    %c0_i32 = arith.constant 0 : i32
    %c0_i32_0 = arith.constant 0 : i32
    return %arg0, %c0_i32 : i32, i32
  }
  func.func @transform_2(%arg0: i32) -> (i32, i32) {
    %c0_i32 = arith.constant 0 : i32
    %c0_i32_0 = arith.constant 0 : i32
    return %arg0, %c0_i32 : i32, i32
  }
  func.func @transform_3(%arg0: i32) -> (i32, i32) {
    %c0_i32 = arith.constant 0 : i32
    %c0_i32_0 = arith.constant 0 : i32
    return %arg0, %c0_i32 : i32, i32
  }
}

</mosaic_0001>

<bundles_post_ra>
// kernel: tpu_custom_call.1
= control target key start
LH: loop header
LB: loop body
LE: loop exit
PB: predicated region body
PF: predicated region fallthrough
CT: control target
= control target key end

     0   :  { %8 = vsyncpa [#allocation3], 0  ;;  %s194_s0 = inlined_call_operand.vmem [shape: f32[8,16], index: 0, kind: input, shape index: {}]   ;;  %s195_s1 = inlined_call_operand.hbm [shape: f32[8,16], index: 1, kind: input, shape index: {}]   ;;  %s196_s2 = inlined_call_operand.vmem [shape: f32[8,2], index: 2, kind: input, shape index: {}]   ;;  %s197_s3 = inlined_call_operand.hbm [shape: f32[1,1], index: 3, kind: output, shape index: {}]  }
   0x1   :  { %9 = vsyncpa [#allocation4], 0  ;;  %s17_s14 = sshll.u32 %s195_s1, 4  ;;  %s158_s15 = smov [#allocation2]   ;;  %s18_s14 = int_to_ptr.hbm [resolvable:$true] %s17_s14 }
   0x2   :  { %s19_s16 = sshll.u32 %s158_s15, 4  ;;  %s20_s16 = int_to_ptr.vmem [resolvable:$true] %s19_s16 }
   0x3   :  { %22 = dma.hbm_to_vmem [thread:$0]  %s18_s14, 128, %s20_s16, [#allocation3]  }
   0x4   :  { %154 = dma.done.wait [#allocation3], 128  }
   0x5   :  { %155 = vsyncadd [#allocation3], 4294967168  ;;  %v159_v0 = vmov 0   ;;  %v31_v1 = vld [vmem:[%s196_s2] sm:$0xff]  ;;  %v33_v11 = vlaneseq  ;;  %vm53_vm3 = vcmask 130048   ;;  %vm72_vm4 = vcmask 7168  }
   0x6   :  { %113 = vset.pattern.permute.xlu0 %v159_v0  ;;  %vm102_vm0 = vcmp.lt.s32.totalorder %v31_v1, 0  ;;  %v103_v2 = vceil.f32 %v31_v1  ;;  %v104_v3 = vfloor.f32 %v31_v1  ;;  %v29_v7 = vld [vmem:[%s194_s0] sm:$0xff]  ;;  %v63_v26 = vsub.f32 1.0, %v31_v1  ;;  %s160_s0 = smov 127   ;;  %s90_s21 = sshll.u32 %s197_s3, 4  ;;  %s91_s21 = int_to_ptr.hbm [resolvable:$true] %s90_s21 }
   0x7   :  { %v30_v8 = vld [vmem:[#allocation2] sm:$0xff]  ;;  %v44_v9 = vmax.f32 %v29_v7, 1e-07  ;;  %v34_v14 = vand.u32 127, %v33_v11  ;;  %v61_v27 = vmul.f32 0.125, %v31_v1  ;;  %s161_s23 = smov [#allocation5]  }
   0x8   :  { %v105_v4 = vsel %vm102_vm0, %v103_v2, %v104_v3  ;;  %v47_v10 = vmax.f32 %v30_v8, 1e-07  ;;  %v64_v28 = vmul.f32 0.075, %v63_v26 }
   0x9   :  { %v106_v5 = vcvt.f32.s32 %v105_v4  ;;  %114 = vlog2.f32 %v44_v9 }
   0xa   :  { %116 = vlog2.f32 %v47_v10 }
   0xb   :  { %36 = vperm.xlu0 %113, %v106_v5   ;;  %v101_v6 = vadd.s32 4294967295, %v106_v5 }
   0xf   :  { %v115_v13 = vpop.eup %114 }
  0x10   :  { %v117_v15 = vpop.eup %116  ;;  %v46_v16 = vmul.f32 0.6931472, %v115_v13 }
  0x11   :  { %v49_v18 = vmul.f32 0.6931472, %v117_v15 }
  0x13   :  { %41 = vperm.xlu0 %113, %v101_v6  }
  0x7d   :  { %v37_v12 = vpop.permute.xlu0 %36 }
  0x7e   :  { %vm38_vm1 = vcmp.eq.s32.totalorder %v34_v14, %v37_v12 }
  0x7f   :  { %v50_v19 = vsel %vm38_vm1, %v46_v16, 0.0  ;;  %v57_v23 = vsel %vm38_vm1, %v49_v18, 0.0 }
  0x80   :  { %v58_v24 = vsel %vm53_vm3, %v57_v23, 0.0 }
  0x85   :  { %v42_v17 = vpop.permute.xlu0 %41 }
  0x86   :  { %vm43_vm2 = vcmp.eq.s32.totalorder %v34_v14, %v42_v17 }
  0x87   :  { %v51_v20 = vsel %vm43_vm2, %v49_v18, 0.0 }
  0x88   :  { %v52_v21 = vadd.f32 %v51_v20, %v50_v19 }
  0x8a   :  { %v54_v22 = vsel %vm53_vm3, %v52_v21, 0.0 }
  0x8b   :  { %55 = vadd.xlane.f32.xlu1 %v54_v22 }
  0x93   :  { %59 = vadd.xlane.f32.xlu1 %v58_v24 }
  0xfe   :  { %v56_v25 = vpop.xlane.xlu1 %55 }
  0xff   :  { %v62_v30 = vmul.f32 %v61_v27, %v56_v25 }
 0x106   :  { %v60_v29 = vpop.xlane.xlu1 %59 }
 0x107   :  { %v65_v31 = vmul.f32 %v64_v28, %v60_v29 }
 0x109   :  { %v66_v32 = vadd.f32 %v65_v31, %v62_v30 }
 0x10b   :  { %v67_v33 = vsub.f32 0.0, %v66_v32 }
 0x10d   :  { %69 = vrot.lane.b32.xlu2 %v67_v33, %s160_s0 }
 0x167   :  { %v70_v34 = vpop.permute.xlu2 %69 }
 0x168   :  { %v73_v35 = vsel %vm72_vm4, %v70_v34, 0.0 }
 0x169   :  { %74 = vadd.xlane.f32.xlu2 %v73_v35 }
 0x1dc   :  { %v75_v36 = vpop.xlane.xlu2 %74 }
 0x1dd   :  { %v76_v37 = vrot.slane %v75_v36, 4 }
 0x1df   :  { %v77_v38 = vadd.f32 %v76_v37, %v75_v36 }
 0x1e1   :  { %v78_v39 = vrot.slane %v77_v38, 2 }
 0x1e3   :  { %v79_v40 = vadd.f32 %v78_v39, %v77_v38 }
 0x1e5   :  { %v80_v41 = vrot.slane %v79_v40, 1 }
 0x1e7   :  { %v81_v42 = vadd.f32 %v80_v41, %v79_v40 }
 0x1e9   :  { %107 = vpush %v81_v42 }
 0x21a   :  { %s108_s22 = spop %107 }
 0x21b   :  { %84 = sst [smem:[#allocation5]] %s108_s22 }
 0x21c   :  { %93 = dma.smem_to_hbm %s161_s23, 16, %s91_s21, [#allocation4]  }
 0x21d   :  { %156 = dma.done.wait [#allocation4], 16  }
 0x21e   :  { %157 = vsyncadd [#allocation4], 4294967280 }
 0x21f   :  { %98 = sfence }
 0x220   :  { %99 = vsyncpa [#allocation3], 1 }
 0x221   :  { %100 = vsyncpa [#allocation4], 1 }

</bundles_post_ra>
